<compile_context>
chip_gen: v5e
topology: v5e:2x2
jax: 0.10.0
libtpu: 0.0.40
codegen_flags: <defaults>
</compile_context>

<pallas_src>
import functools

import jax
import jax.numpy as jnp
from jax.experimental import pallas as pl
from jax.experimental.pallas import tpu as pltpu

HIDDEN = 128
BN_EPS = 1e-5
_LANE = 128
_VMEM_LIMIT = 32 * 1024 * 1024           # explicit scoped-VMEM request (safe on v5e/v6e/v7x)
_NET_SCRATCH_BUDGET = 12 * 1024 * 1024   # max bytes for the persistent f32 `net` scratch


def _round_up(x, m):
    return ((x + m - 1) // m) * m


# ---------------------------------------------------------------------------
# Fused kernel: grid = (phase, batch_tile), phase-major.
# ---------------------------------------------------------------------------
def _cnet_kernel(*refs, block_batch, batch, num_tiles, need_mask, keep_net,
                 inv_batch):
    if keep_net:
        (s_ref, a_ref, ws_ref, wa_ref, bin_ref, wfc_ref, wout_ref, bout_ref,
         o_ref, net_sc, sum_sc, sq_sc, weff_sc, c_sc) = refs
    else:
        (s_ref, a_ref, ws_ref, wa_ref, bin_ref, wfc_ref, wout_ref, bout_ref,
         o_ref, sum_sc, sq_sc, weff_sc, c_sc) = refs
        net_sc = None

    phase = pl.program_id(0)
    t = pl.program_id(1)

    def compute_net():
        h = jnp.dot(s_ref[...], ws_ref[...], preferred_element_type=jnp.float32)
        h = h + jnp.dot(a_ref[...], wa_ref[...], preferred_element_type=jnp.float32)
        h = jnp.maximum(h + bin_ref[...], 0.0)
        # NOTE: fc's bias is intentionally omitted -- with training-mode BN
        # (beta=0) it is exactly cancelled by the mean subtraction.
        return jnp.dot(h.astype(wfc_ref.dtype), wfc_ref[...],
                       preferred_element_type=jnp.float32)

    # ---- phase 0: compute net, stash it, accumulate BN statistics ----------
    @pl.when(phase == 0)
    def _stats_phase():
        @pl.when(t == 0)
        def _init():
            sum_sc[...] = jnp.zeros_like(sum_sc)
            sq_sc[...] = jnp.zeros_like(sq_sc)

        net = compute_net()

        if keep_net:
            row0 = pl.multiple_of(t * block_batch, block_batch)
            net_sc[pl.ds(row0, block_batch), :] = net

        def accumulate(n):
            sum_sc[...] += jnp.sum(n, axis=0, keepdims=True)
            sq_sc[...] += jnp.sum(n * n, axis=0, keepdims=True)

        if need_mask:
            # Only the last tile contains batch-padding rows.
            @pl.when(t == num_tiles - 1)
            def _masked():
                row = (jax.lax.broadcasted_iota(jnp.int32, (block_batch, 1), 0)
                       + t * block_batch)
                accumulate(net * (row < batch).astype(jnp.float32))

            @pl.when(t != num_tiles - 1)
            def _full():
                accumulate(net)
        else:
            accumulate(net)

    # ---- phase 1: fold BN into the head once, project every tile -----------
    @pl.when(phase == 1)
    def _apply_phase():
        @pl.when(t == 0)
        def _fold():
            mean = sum_sc[...] * inv_batch                               # (1,H)
            var = jnp.maximum(sq_sc[...] * inv_batch - mean * mean, 0.0)
            inv_std = jax.lax.rsqrt(var + BN_EPS)
            w_eff = wout_ref[...] * inv_std                              # (1,H)
            weff_sc[...] = w_eff
            c_sc[...] = bout_ref[...] - jnp.sum(mean * w_eff, axis=-1,
                                                keepdims=True)           # (1,1)

        if keep_net:
            row0 = pl.multiple_of(t * block_batch, block_batch)
            net = net_sc[pl.ds(row0, block_batch), :]
        else:
            net = compute_net()

        scaled = net * weff_sc[...]                                      # (blk,H) f32
        # Lane-dense (1, block_batch) output row: XLU transpose + sublane reduce
        # instead of a (block_batch, 1) column of masked stores.
        o_ref[...] = jnp.sum(scaled.T, axis=0, keepdims=True) + c_sc[...]


# ---------------------------------------------------------------------------
# Wrapper
# ---------------------------------------------------------------------------
def pack_params(raw, compute_dtype=jnp.float32):
    """Re-layout CNet parameters for the kernel.

    bf16 `compute_dtype` is recommended on v5e, v6e and v7x (the MXU runs bf16
    at full rate and it halves the s/a HBM reads); BN statistics, rsqrt and the
    final projection stay in f32 either way.
    """
    return dict(
        w_s=raw["ws"].astype(compute_dtype),
        w_a=raw["wa"].astype(compute_dtype),
        b_in=(raw["bs"] + raw["ba"]).astype(jnp.float32),
        wfc=raw["wfc"].astype(compute_dtype),
        wout_row=raw["wout"].reshape(1, HIDDEN).astype(jnp.float32),
        bout=raw["bout"].reshape(1, 1).astype(jnp.float32),
        # raw["bfc"] deliberately dropped: exactly cancelled by BatchNorm (beta=0).
    )


def cnet_forward(s, a, packed, *, max_block_batch=4096,
                 net_scratch_budget=_NET_SCRATCH_BUDGET):
    """s: (B, s_dim), a: (B, a_dim) -> (B, 1) f32."""
    B = s.shape[0]
    compute_dtype = packed["w_s"].dtype
    s_dim = packed["w_s"].shape[0]
    a_dim = packed["w_a"].shape[0]
    assert s.shape == (B, s_dim) and a.shape == (B, a_dim)

    # Batch tiling: tiles are multiples of 128 rows (lane-dense output rows).
    max_block = max(_LANE, _round_up(min(max_block_batch, max(B, 1)), _LANE))
    num_tiles = -(-B // max_block)
    block_batch = _round_up(-(-B // num_tiles), _LANE)
    padded_b = block_batch * num_tiles
    need_mask = padded_b != B

    s = s.astype(compute_dtype)
    a = a.astype(compute_dtype)
    if need_mask:
        s = jnp.pad(s, ((0, padded_b - B), (0, 0)))
        a = jnp.pad(a, ((0, padded_b - B), (0, 0)))

    # Persistent-`net` scratch (phase 1 reuses phase 0's matmuls) unless the
    # batch is too large for VMEM, in which case phase 1 recomputes.
    keep_net = padded_b * HIDDEN * 4 <= net_scratch_budget

    if keep_net:
        sa_map = lambda p, t: (t * (1 - p), 0)   # phase 1 parks on block 0
    else:
        sa_map = lambda p, t: (t, 0)             # phase 1 re-reads tiles
    const = lambda p, t: (0, 0)

    in_specs = [
        pl.BlockSpec((block_batch, s_dim), sa_map),
        pl.BlockSpec((block_batch, a_dim), sa_map),
        pl.BlockSpec((s_dim, HIDDEN), const),
        pl.BlockSpec((a_dim, HIDDEN), const),
        pl.BlockSpec((1, HIDDEN), const),
        pl.BlockSpec((HIDDEN, HIDDEN), const),
        pl.BlockSpec((1, HIDDEN), const),
        pl.BlockSpec((1, 1), const),
    ]
    # Lane-dense output: one (1, block_batch) row per tile, written in phase 1.
    out_spec = pl.BlockSpec((1, block_batch), lambda p, t: (0, t * p))

    scratch = []
    if keep_net:
        scratch.append(pltpu.VMEM((padded_b, HIDDEN), jnp.float32))
    scratch += [pltpu.VMEM((1, HIDDEN), jnp.float32),   # sum
                pltpu.VMEM((1, HIDDEN), jnp.float32),   # sum of squares
                pltpu.VMEM((1, HIDDEN), jnp.float32),   # folded w_eff
                pltpu.VMEM((1, 1), jnp.float32)]        # folded bias c

    kernel = functools.partial(
        _cnet_kernel, block_batch=block_batch, batch=B, num_tiles=num_tiles,
        need_mask=need_mask, keep_net=keep_net, inv_batch=1.0 / B)

    out_row = pl.pallas_call(
        kernel,
        grid=(2, num_tiles),                  # (phase, batch tile), phase-major
        in_specs=in_specs,
        out_specs=out_spec,
        out_shape=jax.ShapeDtypeStruct((1, padded_b), jnp.float32),
        scratch_shapes=scratch,
        compiler_params=pltpu.CompilerParams(
            dimension_semantics=("arbitrary", "arbitrary"),
            vmem_limit_bytes=_VMEM_LIMIT),
    )(s, a, packed["w_s"], packed["w_a"], packed["b_in"], packed["wfc"],
      packed["wout_row"], packed["bout"])

    out = out_row.reshape(padded_b, 1)
    return out[:B] if need_mask else out


# ---------------------------------------------------------------------------
# Deterministic init (mirrors CNet.__init__) and pure-JAX reference
# ---------------------------------------------------------------------------
def init_params(key, s_dim, a_dim):
    """Weights ~ N(0, 0.1); biases ~ U(-1/sqrt(fan_in), 1/sqrt(fan_in))."""
    ks = jax.random.split(key, 8)

    def lin(kw, kb, fan_in, fan_out):
        w = 0.1 * jax.random.normal(kw, (fan_in, fan_out), jnp.float32)
        bound = 1.0 / jnp.sqrt(jnp.float32(fan_in))
        b = jax.random.uniform(kb, (1, fan_out), jnp.float32, -bound, bound)
        return w, b

    ws, bs = lin(ks[0], ks[1], s_dim, HIDDEN)
    wa, ba = lin(ks[2], ks[3], a_dim, HIDDEN)
    wfc, bfc = lin(ks[4], ks[5], HIDDEN, HIDDEN)
    wout, bout = lin(ks[6], ks[7], HIDDEN, 1)
    return dict(ws=ws, bs=bs, wa=wa, ba=ba, wfc=wfc, bfc=bfc,
                wout=wout, bout=bout)


def cnet_reference(s, a, p):
    x = s @ p["ws"] + p["bs"]
    y = a @ p["wa"] + p["ba"]
    net = jnp.maximum(x + y, 0.0)
    net = net @ p["wfc"] + p["bfc"]
    mean = jnp.mean(net, axis=0, keepdims=True)
    var = jnp.mean((net - mean) ** 2, axis=0, keepdims=True)
    net = (net - mean) / jnp.sqrt(var + BN_EPS)
    return net @ p["wout"] + p["bout"]


if __name__ == "__main__":
    key = jax.random.PRNGKey(0)
    k_s, k_a, k_p, k_s2, k_a2 = jax.random.split(key, 5)

    B, S_DIM, A_DIM = 8, 16, 8
    s = jax.random.normal(k_s, (B, S_DIM), jnp.float32)
    a = jax.random.normal(k_a, (B, A_DIM), jnp.float32)
    raw = init_params(k_p, S_DIM, A_DIM)
    packed = pack_params(raw)
    ref = cnet_reference(s, a, raw)

    # Case 1: tiny batch, single tile, f32, persistent-net scratch path.
    out = jax.block_until_ready(cnet_forward(s, a, packed))
    assert out.shape == (B, 1)
    assert jnp.allclose(out, ref, atol=1e-4, rtol=1e-4)

    # Case 2: multi-tile batch not a multiple of the tile: exercises the fused
    # two-phase BN, last-tile masking and lane-dense multi-block output.
    B2 = 300
    s2 = jax.random.normal(k_s2, (B2, S_DIM), jnp.float32)
    a2 = jax.random.normal(k_a2, (B2, A_DIM), jnp.float32)
    ref2 = cnet_reference(s2, a2, raw)
    out2 = jax.block_until_ready(cnet_forward(s2, a2, packed, max_block_batch=128))
    assert out2.shape == (B2, 1)
    assert jnp.allclose(out2, ref2, atol=1e-4, rtol=1e-4)

    # Case 2b: force the recompute fallback (no persistent net scratch).
    out2b = jax.block_until_ready(
        cnet_forward(s2, a2, packed, max_block_batch=128, net_scratch_budget=0))
    assert jnp.allclose(out2b, ref2, atol=1e-4, rtol=1e-4)

    # Case 3: bf16 MXU operands (recommended on all generations); BN stats f32.
    packed_bf16 = pack_params(raw, compute_dtype=jnp.bfloat16)
    out3 = jax.block_until_ready(cnet_forward(s, a, packed_bf16))
    assert out3.shape == (B, 1)
    assert bool(jnp.all(jnp.isfinite(out3)))
    assert jnp.allclose(out3, ref, atol=1.5e-1, rtol=1e-1)

    print("KERNEL_OK")
</pallas_src>

<mosaic_0001>
module attributes {stable_mosaic.version = 11 : i64} {
  func.func @_cnet_kernel(%arg0: i32, %arg1: i32, %arg2: memref<128x16xf32, #tpu.memory_space<vmem>>, %arg3: memref<128x8xf32, #tpu.memory_space<vmem>>, %arg4: memref<16x128xf32, #tpu.memory_space<vmem>>, %arg5: memref<8x128xf32, #tpu.memory_space<vmem>>, %arg6: memref<1x128xf32, #tpu.memory_space<vmem>>, %arg7: memref<128x128xf32, #tpu.memory_space<vmem>>, %arg8: memref<1x128xf32, #tpu.memory_space<vmem>>, %arg9: memref<1x1xf32, #tpu.memory_space<vmem>>, %arg10: memref<1x128xf32, #tpu.memory_space<vmem>>, %arg11: memref<128x128xf32, #tpu.memory_space<vmem>>, %arg12: memref<1x128xf32, #tpu.memory_space<vmem>>, %arg13: memref<1x128xf32, #tpu.memory_space<vmem>>, %arg14: memref<1x128xf32, #tpu.memory_space<vmem>>, %arg15: memref<1x1xf32, #tpu.memory_space<vmem>>) attributes {dimension_semantics = [#tpu.dimension_semantics<arbitrary>, #tpu.dimension_semantics<arbitrary>], iteration_bounds = array<i64: 2, 1>, scalar_prefetch = 0 : i64, scratch_operands = 5 : i64, tpu.core_type = #tpu.core_type<tc>, window_params = [{transform_indices = @transform_0, window_bounds = array<i64: 128, 16>}, {transform_indices = @transform_1, window_bounds = array<i64: 128, 8>}, {pipeline_mode = #tpu.pipeline_mode<synchronous>, transform_indices = @transform_2, window_bounds = array<i64: 16, 128>}, {pipeline_mode = #tpu.pipeline_mode<synchronous>, transform_indices = @transform_3, window_bounds = array<i64: 8, 128>}, {pipeline_mode = #tpu.pipeline_mode<synchronous>, transform_indices = @transform_4, window_bounds = array<i64: 1, 128>}, {pipeline_mode = #tpu.pipeline_mode<synchronous>, transform_indices = @transform_5, window_bounds = array<i64: 128, 128>}, {pipeline_mode = #tpu.pipeline_mode<synchronous>, transform_indices = @transform_6, window_bounds = array<i64: 1, 128>}, {pipeline_mode = #tpu.pipeline_mode<synchronous>, transform_indices = @transform_7, window_bounds = array<i64: 1, 1>}, {transform_indices = @transform_8, window_bounds = array<i64: 1, 128>}]} {
    %c0_i32 = arith.constant 0 : i32
    %0 = arith.cmpi eq, %arg0, %c0_i32 : i32
    %1 = arith.extui %0 : i1 to i32
    %c0_i32_0 = arith.constant 0 : i32
    %2 = arith.cmpi ne, %1, %c0_i32_0 : i32
    scf.if %2 {
      %c0_i32_2 = arith.constant 0 : i32
      %6 = arith.cmpi eq, %arg1, %c0_i32_2 : i32
      %7 = arith.extui %6 : i1 to i32
      %c0_i32_3 = arith.constant 0 : i32
      %8 = arith.cmpi ne, %7, %c0_i32_3 : i32
      scf.if %8 {
        %cst_23 = arith.constant 0.000000e+00 : f32
        %33 = vector.broadcast %cst_23 : f32 to vector<1x128xf32>
        %c0_24 = arith.constant 0 : index
        %c0_25 = arith.constant 0 : index
        %34 = vector.load %arg12[%c0_24, %c0_25] : memref<1x128xf32, #tpu.memory_space<vmem>>, vector<1x128xf32>
        tpu.vector_store %arg12[%c0_24, %c0_25], %33 {strides = array<i32>} : memref<1x128xf32, #tpu.memory_space<vmem>>, vector<1x128xf32>,
        %cst_26 = arith.constant 0.000000e+00 : f32
        %35 = vector.broadcast %cst_26 : f32 to vector<1x128xf32>
        %c0_27 = arith.constant 0 : index
        %c0_28 = arith.constant 0 : index
        %36 = vector.load %arg13[%c0_27, %c0_28] : memref<1x128xf32, #tpu.memory_space<vmem>>, vector<1x128xf32>
        tpu.vector_store %arg13[%c0_27, %c0_28], %35 {strides = array<i32>} : memref<1x128xf32, #tpu.memory_space<vmem>>, vector<1x128xf32>,
      } else {
      }
      %c0 = arith.constant 0 : index
      %c0_4 = arith.constant 0 : index
      %9 = vector.load %arg2[%c0, %c0_4] : memref<128x16xf32, #tpu.memory_space<vmem>>, vector<128x16xf32>
      %c0_5 = arith.constant 0 : index
      %c0_6 = arith.constant 0 : index
      %10 = vector.load %arg4[%c0_5, %c0_6] : memref<16x128xf32, #tpu.memory_space<vmem>>, vector<16x128xf32>
      %cst = arith.constant dense<0.000000e+00> : vector<128x128xf32>
      %11 = tpu.matmul %9, %10, %cst {dimension_numbers = #tpu.dot_dimension_numbers<[1], [0], [0], [1], [0, 0, 1, 1], [], []>} : vector<128x16xf32>, vector<16x128xf32>, vector<128x128xf32> -> vector<128x128xf32>
      %c0_7 = arith.constant 0 : index
      %c0_8 = arith.constant 0 : index
      %12 = vector.load %arg3[%c0_7, %c0_8] : memref<128x8xf32, #tpu.memory_space<vmem>>, vector<128x8xf32>
      %c0_9 = arith.constant 0 : index
      %c0_10 = arith.constant 0 : index
      %13 = vector.load %arg5[%c0_9, %c0_10] : memref<8x128xf32, #tpu.memory_space<vmem>>, vector<8x128xf32>
      %cst_11 = arith.constant dense<0.000000e+00> : vector<128x128xf32>
      %14 = tpu.matmul %12, %13, %cst_11 {dimension_numbers = #tpu.dot_dimension_numbers<[1], [0], [0], [1], [0, 0, 1, 1], [], []>} : vector<128x8xf32>, vector<8x128xf32>, vector<128x128xf32> -> vector<128x128xf32>
      %15 = arith.addf %11, %14 : vector<128x128xf32>
      %c0_12 = arith.constant 0 : index
      %c0_13 = arith.constant 0 : index
      %16 = vector.load %arg6[%c0_12, %c0_13] : memref<1x128xf32, #tpu.memory_space<vmem>>, vector<1x128xf32>
      %17 = vector.broadcast %16 : vector<1x128xf32> to vector<128x128xf32>
      %18 = arith.addf %15, %17 : vector<128x128xf32>
      %cst_14 = arith.constant 0.000000e+00 : f32
      %19 = vector.broadcast %cst_14 : f32 to vector<128x128xf32>
      %20 = arith.maximumf %18, %19 : vector<128x128xf32>
      %c0_15 = arith.constant 0 : index
      %c0_16 = arith.constant 0 : index
      %21 = vector.load %arg7[%c0_15, %c0_16] : memref<128x128xf32, #tpu.memory_space<vmem>>, vector<128x128xf32>
      %cst_17 = arith.constant dense<0.000000e+00> : vector<128x128xf32>
      %22 = tpu.matmul %20, %21, %cst_17 {dimension_numbers = #tpu.dot_dimension_numbers<[1], [0], [0], [1], [0, 0, 1, 1], [], []>} : vector<128x128xf32>, vector<128x128xf32>, vector<128x128xf32> -> vector<128x128xf32>
      %c128_i32 = arith.constant 128 : i32
      %23 = arith.muli %arg1, %c128_i32 : i32
      %24 = tpu.assume_multiple %23, 128 : i32
      %25 = arith.index_cast %24 : i32 to index
      %c0_18 = arith.constant 0 : index
      %26 = vector.load %arg11[%25, %c0_18] : memref<128x128xf32, #tpu.memory_space<vmem>>, vector<128x128xf32>
      tpu.vector_store %arg11[%25, %c0_18], %22 {strides = array<i32>} : memref<128x128xf32, #tpu.memory_space<vmem>>, vector<128x128xf32>,
      %c0_i32_19 = arith.constant 0 : i32
      %27 = arith.cmpi eq, %arg1, %c0_i32_19 : i32
      %28 = arith.extui %27 : i1 to i32
      %c0_i32_20 = arith.constant 0 : i32
      %29 = arith.cmpi ne, %28, %c0_i32_20 : i32
      scf.if %29 {
        %33 = tpu.iota {dimensions = array<i32: 0>} : vector<128x1xi32>
        %c128_i32_23 = arith.constant 128 : i32
        %34 = arith.muli %arg1, %c128_i32_23 : i32
        %35 = vector.broadcast %34 : i32 to vector<128x1xi32>
        %36 = arith.addi %33, %35 : vector<128x1xi32>
        %c8_i32 = arith.constant 8 : i32
        %37 = vector.broadcast %c8_i32 : i32 to vector<128x1xi32>
        %38 = arith.cmpi slt, %36, %37 : vector<128x1xi32>
        %39 = arith.extui %38 : vector<128x1xi1> to vector<128x1xi32>
        %40 = arith.sitofp %39 : vector<128x1xi32> to vector<128x1xf32>
        %41 = vector.broadcast %40 : vector<128x1xf32> to vector<128x128xf32>
        %42 = arith.mulf %22, %41 : vector<128x128xf32>
        %c0_24 = arith.constant 0 : index
        %c0_25 = arith.constant 0 : index
        %43 = vector.load %arg12[%c0_24, %c0_25] : memref<1x128xf32, #tpu.memory_space<vmem>>, vector<1x128xf32>
        %cst_26 = arith.constant dense<0.000000e+00> : vector<128xf32>
        %44 = vector.multi_reduction <add>, %42, %cst_26 [0] : vector<128x128xf32> to vector<128xf32>
        %45 = vector.shape_cast %44 : vector<128xf32> to vector<1x128xf32>
        %46 = arith.addf %43, %45 : vector<1x128xf32>
        %c0_27 = arith.constant 0 : index
        %c0_28 = arith.constant 0 : index
        %47 = vector.load %arg12[%c0_27, %c0_28] : memref<1x128xf32, #tpu.memory_space<vmem>>, vector<1x128xf32>
        tpu.vector_store %arg12[%c0_27, %c0_28], %46 {strides = array<i32>} : memref<1x128xf32, #tpu.memory_space<vmem>>, vector<1x128xf32>,
        %c0_29 = arith.constant 0 : index
        %c0_30 = arith.constant 0 : index
        %48 = vector.load %arg13[%c0_29, %c0_30] : memref<1x128xf32, #tpu.memory_space<vmem>>, vector<1x128xf32>
        %49 = arith.mulf %42, %42 : vector<128x128xf32>
        %cst_31 = arith.constant dense<0.000000e+00> : vector<128xf32>
        %50 = vector.multi_reduction <add>, %49, %cst_31 [0] : vector<128x128xf32> to vector<128xf32>
        %51 = vector.shape_cast %50 : vector<128xf32> to vector<1x128xf32>
        %52 = arith.addf %48, %51 : vector<1x128xf32>
        %c0_32 = arith.constant 0 : index
        %c0_33 = arith.constant 0 : index
        %53 = vector.load %arg13[%c0_32, %c0_33] : memref<1x128xf32, #tpu.memory_space<vmem>>, vector<1x128xf32>
        tpu.vector_store %arg13[%c0_32, %c0_33], %52 {strides = array<i32>} : memref<1x128xf32, #tpu.memory_space<vmem>>, vector<1x128xf32>,
      } else {
      }
      %c0_i32_21 = arith.constant 0 : i32
      %30 = arith.cmpi ne, %arg1, %c0_i32_21 : i32
      %31 = arith.extui %30 : i1 to i32
      %c0_i32_22 = arith.constant 0 : i32
      %32 = arith.cmpi ne, %31, %c0_i32_22 : i32
      scf.if %32 {
        %c0_23 = arith.constant 0 : index
        %c0_24 = arith.constant 0 : index
        %33 = vector.load %arg12[%c0_23, %c0_24] : memref<1x128xf32, #tpu.memory_space<vmem>>, vector<1x128xf32>
        %cst_25 = arith.constant dense<0.000000e+00> : vector<128xf32>
        %34 = vector.multi_reduction <add>, %22, %cst_25 [0] : vector<128x128xf32> to vector<128xf32>
        %35 = vector.shape_cast %34 : vector<128xf32> to vector<1x128xf32>
        %36 = arith.addf %33, %35 : vector<1x128xf32>
        %c0_26 = arith.constant 0 : index
        %c0_27 = arith.constant 0 : index
        %37 = vector.load %arg12[%c0_26, %c0_27] : memref<1x128xf32, #tpu.memory_space<vmem>>, vector<1x128xf32>
        tpu.vector_store %arg12[%c0_26, %c0_27], %36 {strides = array<i32>} : memref<1x128xf32, #tpu.memory_space<vmem>>, vector<1x128xf32>,
        %c0_28 = arith.constant 0 : index
        %c0_29 = arith.constant 0 : index
        %38 = vector.load %arg13[%c0_28, %c0_29] : memref<1x128xf32, #tpu.memory_space<vmem>>, vector<1x128xf32>
        %39 = arith.mulf %22, %22 : vector<128x128xf32>
        %cst_30 = arith.constant dense<0.000000e+00> : vector<128xf32>
        %40 = vector.multi_reduction <add>, %39, %cst_30 [0] : vector<128x128xf32> to vector<128xf32>
        %41 = vector.shape_cast %40 : vector<128xf32> to vector<1x128xf32>
        %42 = arith.addf %38, %41 : vector<1x128xf32>
        %c0_31 = arith.constant 0 : index
        %c0_32 = arith.constant 0 : index
        %43 = vector.load %arg13[%c0_31, %c0_32] : memref<1x128xf32, #tpu.memory_space<vmem>>, vector<1x128xf32>
        tpu.vector_store %arg13[%c0_31, %c0_32], %42 {strides = array<i32>} : memref<1x128xf32, #tpu.memory_space<vmem>>, vector<1x128xf32>,
      } else {
      }
    } else {
    }
    %c1_i32 = arith.constant 1 : i32
    %3 = arith.cmpi eq, %arg0, %c1_i32 : i32
    %4 = arith.extui %3 : i1 to i32
    %c0_i32_1 = arith.constant 0 : i32
    %5 = arith.cmpi ne, %4, %c0_i32_1 : i32
    scf.if %5 {
      %c0_i32_2 = arith.constant 0 : i32
      %6 = arith.cmpi eq, %arg1, %c0_i32_2 : i32
      %7 = arith.extui %6 : i1 to i32
      %c0_i32_3 = arith.constant 0 : i32
      %8 = arith.cmpi ne, %7, %c0_i32_3 : i32
      scf.if %8 {
        %c0_10 = arith.constant 0 : index
        %c0_11 = arith.constant 0 : index
        %23 = vector.load %arg12[%c0_10, %c0_11] : memref<1x128xf32, #tpu.memory_space<vmem>>, vector<1x128xf32>
        %cst_12 = arith.constant 1.250000e-01 : f32
        %24 = vector.broadcast %cst_12 : f32 to vector<1x128xf32>
        %25 = arith.mulf %23, %24 : vector<1x128xf32>
        %c0_13 = arith.constant 0 : index
        %c0_14 = arith.constant 0 : index
        %26 = vector.load %arg13[%c0_13, %c0_14] : memref<1x128xf32, #tpu.memory_space<vmem>>, vector<1x128xf32>
        %cst_15 = arith.constant 1.250000e-01 : f32
        %27 = vector.broadcast %cst_15 : f32 to vector<1x128xf32>
        %28 = arith.mulf %26, %27 : vector<1x128xf32>
        %29 = arith.mulf %25, %25 : vector<1x128xf32>
        %30 = arith.subf %28, %29 : vector<1x128xf32>
        %cst_16 = arith.constant 0.000000e+00 : f32
        %31 = vector.broadcast %cst_16 : f32 to vector<1x128xf32>
        %32 = arith.maximumf %30, %31 : vector<1x128xf32>
        %cst_17 = arith.constant 9.99999974E-6 : f32
        %33 = vector.broadcast %cst_17 : f32 to vector<1x128xf32>
        %34 = arith.addf %32, %33 : vector<1x128xf32>
        %35 = math.rsqrt %34 : vector<1x128xf32>
        %c0_18 = arith.constant 0 : index
        %c0_19 = arith.constant 0 : index
        %36 = vector.load %arg8[%c0_18, %c0_19] : memref<1x128xf32, #tpu.memory_space<vmem>>, vector<1x128xf32>
        %37 = arith.mulf %36, %35 : vector<1x128xf32>
        %c0_20 = arith.constant 0 : index
        %c0_21 = arith.constant 0 : index
        %38 = vector.load %arg14[%c0_20, %c0_21] : memref<1x128xf32, #tpu.memory_space<vmem>>, vector<1x128xf32>
        tpu.vector_store %arg14[%c0_20, %c0_21], %37 {strides = array<i32>} : memref<1x128xf32, #tpu.memory_space<vmem>>, vector<1x128xf32>,
        %c0_22 = arith.constant 0 : index
        %c0_23 = arith.constant 0 : index
        %39 = vector.load %arg9[%c0_22, %c0_23] : memref<1x1xf32, #tpu.memory_space<vmem>>, vector<1x1xf32>
        %40 = arith.mulf %25, %37 : vector<1x128xf32>
        %cst_24 = arith.constant dense<0.000000e+00> : vector<1xf32>
        %41 = vector.multi_reduction <add>, %40, %cst_24 [1] : vector<1x128xf32> to vector<1xf32>
        %42 = vector.shape_cast %41 : vector<1xf32> to vector<1x1xf32>
        %43 = arith.subf %39, %42 : vector<1x1xf32>
        %c0_25 = arith.constant 0 : index
        %c0_26 = arith.constant 0 : index
        %44 = vector.load %arg15[%c0_25, %c0_26] : memref<1x1xf32, #tpu.memory_space<vmem>>, vector<1x1xf32>
        tpu.vector_store %arg15[%c0_25, %c0_26], %43 {strides = array<i32>} : memref<1x1xf32, #tpu.memory_space<vmem>>, vector<1x1xf32>,
      } else {
      }
      %c128_i32 = arith.constant 128 : i32
      %9 = arith.muli %arg1, %c128_i32 : i32
      %10 = tpu.assume_multiple %9, 128 : i32
      %11 = arith.index_cast %10 : i32 to index
      %c0 = arith.constant 0 : index
      %12 = vector.load %arg11[%11, %c0] : memref<128x128xf32, #tpu.memory_space<vmem>>, vector<128x128xf32>
      %c0_4 = arith.constant 0 : index
      %c0_5 = arith.constant 0 : index
      %13 = vector.load %arg14[%c0_4, %c0_5] : memref<1x128xf32, #tpu.memory_space<vmem>>, vector<1x128xf32>
      %14 = vector.broadcast %13 : vector<1x128xf32> to vector<128x128xf32>
      %15 = arith.mulf %12, %14 : vector<128x128xf32>
      %16 = tpu.transpose %15, [1, 0] : vector<128x128xf32> -> vector<128x128xf32>
      %cst = arith.constant dense<0.000000e+00> : vector<128xf32>
      %17 = vector.multi_reduction <add>, %16, %cst [0] : vector<128x128xf32> to vector<128xf32>
      %18 = vector.shape_cast %17 : vector<128xf32> to vector<1x128xf32>
      %c0_6 = arith.constant 0 : index
      %c0_7 = arith.constant 0 : index
      %19 = vector.load %arg15[%c0_6, %c0_7] : memref<1x1xf32, #tpu.memory_space<vmem>>, vector<1x1xf32>
      %20 = vector.broadcast %19 : vector<1x1xf32> to vector<1x128xf32>
      %21 = arith.addf %18, %20 : vector<1x128xf32>
      %c0_8 = arith.constant 0 : index
      %c0_9 = arith.constant 0 : index
      %22 = vector.load %arg10[%c0_8, %c0_9] : memref<1x128xf32, #tpu.memory_space<vmem>>, vector<1x128xf32>
      tpu.vector_store %arg10[%c0_8, %c0_9], %21 {strides = array<i32>} : memref<1x128xf32, #tpu.memory_space<vmem>>, vector<1x128xf32>,
    } else {
    }
    return
  }
  func.func @transform_0(%arg0: i32, %arg1: i32) -> (i32, i32) {
    %c1_i32 = arith.constant 1 : i32
    %0 = arith.subi %c1_i32, %arg0 : i32
    %1 = arith.muli %arg1, %0 : i32
    %c0_i32 = arith.constant 0 : i32
    %c0_i32_0 = arith.constant 0 : i32
    return %1, %c0_i32 : i32, i32
  }
  func.func @transform_1(%arg0: i32, %arg1: i32) -> (i32, i32) {
    %c1_i32 = arith.constant 1 : i32
    %0 = arith.subi %c1_i32, %arg0 : i32
    %1 = arith.muli %arg1, %0 : i32
    %c0_i32 = arith.constant 0 : i32
    %c0_i32_0 = arith.constant 0 : i32
    return %1, %c0_i32 : i32, i32
  }
  func.func @transform_2(%arg0: i32, %arg1: i32) -> (i32, i32) {
    %c0_i32 = arith.constant 0 : i32
    %c0_i32_0 = arith.constant 0 : i32
    %c0_i32_1 = arith.constant 0 : i32
    return %c0_i32, %c0_i32_0 : i32, i32
  }
  func.func @transform_3(%arg0: i32, %arg1: i32) -> (i32, i32) {
    %c0_i32 = arith.constant 0 : i32
    %c0_i32_0 = arith.constant 0 : i32
    %c0_i32_1 = arith.constant 0 : i32
    return %c0_i32, %c0_i32_0 : i32, i32
  }
  func.func @transform_4(%arg0: i32, %arg1: i32) -> (i32, i32) {
    %c0_i32 = arith.constant 0 : i32
    %c0_i32_0 = arith.constant 0 : i32
    %c0_i32_1 = arith.constant 0 : i32
    return %c0_i32, %c0_i32_0 : i32, i32
  }
  func.func @transform_5(%arg0: i32, %arg1: i32) -> (i32, i32) {
    %c0_i32 = arith.constant 0 : i32
    %c0_i32_0 = arith.constant 0 : i32
    %c0_i32_1 = arith.constant 0 : i32
    return %c0_i32, %c0_i32_0 : i32, i32
  }
  func.func @transform_6(%arg0: i32, %arg1: i32) -> (i32, i32) {
    %c0_i32 = arith.constant 0 : i32
    %c0_i32_0 = arith.constant 0 : i32
    %c0_i32_1 = arith.constant 0 : i32
    return %c0_i32, %c0_i32_0 : i32, i32
  }
  func.func @transform_7(%arg0: i32, %arg1: i32) -> (i32, i32) {
    %c0_i32 = arith.constant 0 : i32
    %c0_i32_0 = arith.constant 0 : i32
    %c0_i32_1 = arith.constant 0 : i32
    return %c0_i32, %c0_i32_0 : i32, i32
  }
  func.func @transform_8(%arg0: i32, %arg1: i32) -> (i32, i32) {
    %0 = arith.muli %arg1, %arg0 : i32
    %c0_i32 = arith.constant 0 : i32
    %c0_i32_0 = arith.constant 0 : i32
    return %c0_i32, %0 : i32, i32
  }
}

</mosaic_0001>

<bundles_post_ra>
// kernel: tpu_custom_call.1
= control target key start
LH: loop header
LB: loop body
LE: loop exit
PB: predicated region body
PF: predicated region fallthrough
CT: control target
= control target key end

     0   :  { %s1706_s0 = inlined_call_operand.vmem [shape: f32[128,16], index: 0, kind: input, shape index: {}]   ;;  %s1707_s1 = inlined_call_operand.vmem [shape: f32[128,8], index: 1, kind: input, shape index: {}]   ;;  %s1708_s2 = inlined_call_operand.vmem [shape: f32[16,128], index: 2, kind: input, shape index: {}]   ;;  %s1709_s3 = inlined_call_operand.vmem [shape: f32[8,128], index: 3, kind: input, shape index: {}]   ;;  %s1710_s4 = inlined_call_operand.vmem [shape: f32[1,128], index: 4, kind: input, shape index: {}]   ;;  %s1711_s5 = inlined_call_operand.vmem [shape: f32[128,128], index: 5, kind: input, shape index: {}]   ;;  %s1712_s6 = inlined_call_operand.vmem [shape: f32[1,128], index: 6, kind: input, shape index: {}]   ;;  %s1713_s7 = inlined_call_operand.<no memory space> [shape: f32[1,1], index: 7, kind: input, shape index: {}]   ;;  %s1714_s8 = inlined_call_operand.hbm [shape: f32[1,128], index: 8, kind: output, shape index: {}]  }
   0x1   :  { %v13_v0 = vstv %s1713_s7 }
   0x2   :  { %14 = vst [vmem:[#allocation7] sm:$0x1] %v13_v0 }
   0x3   :  { %15 = vsyncpa [#allocation9], 0 }
   0x4   :  { %17 = vsyncpa [#allocation9 + $0x1], 0  ;;  %s1456_s29 = smov 0   ;;  %s1458_s30 = smov 0  }
   0x5   :  { %s1460_s9 = smov 0  }
   0x6 LB: > { %s1244_s7 = sadd.s32 4294967295, %s1403_s9   ;;  %s1245_s10 = sadd.s32 4294967294, %s1403_s9   ;;  %s1403_s9 = sphi %s1460_s9, %s23_s9   ;;  %s1399_s30 = sphi %s1458_s30, %s1716_s30   ;;  %s1395_s29 = sphi %s1456_s29, %s1715_s29  }
   0x7   : > { %s35_s11 = sadd.s32 1, %s1399_s30  ;;  %p1250_p0 = scmp.ge.s32.totalorder %s1403_s9, 1 }
   0x8   : > { %p37_p1 = scmp.ge.s32.totalorder %s35_s11, 2  ;;  %p309_p2 = scmp.lt.s32.totalorder %s1403_s9, 3 }
   0xa   : > { %s1718_s11 = smov (%p37_p1, %s35_s11), 0  ;;  %p310_p3 = pnand %p1250_p0, %p309_p2 }
   0xb   : > { %p1251_p4 = scmp.ne.s32.totalorder (!%p310_p3), %s1395_s29, 0 }
   0xc   : > { %313 = sbr.rel (%p310_p3) target bundleno = 819 (0x333), region = 52 }
  0x11   : > { %375 = sbr.rel (%p1251_p4) target bundleno = 431 (0x1af), region = 56 }
  0x16   : > { %v399_v1 = vld [vmem:[%s1708_s2 + $0x8] sm:$0xff]  ;;  %v416_v2 = vld [vmem:[%s1709_s3] sm:$0xff]  ;;  %vm417_vm0 = vcmask 64512   ;;  %vm531_vm1 = vcmask 130048   ;;  %v402_v8 = vld [vmem:[%s1707_s1 + $0x10] sm:$0xff] }
  0x17   : > { %v398_v3 = vld [vmem:[%s1708_s2] sm:$0xff]  ;;  %594 = vmatpush.msra.mxu1 %v399_v1  ;;  %481 = vmatpush.msra.mxu0 %v416_v2  ;;  %v401_v6 = vld [vmem:[%s1707_s1 + $0x8] sm:$0xff]  ;;  %v384_v9 = vld [vmem:[%s1706_s0 + $0x10] sm:$0xff] }
  0x18   : > { %v400_v4 = vld [vmem:[%s1707_s1] sm:$0xff]  ;;  %v383_v7 = vld [vmem:[%s1706_s0 + $0x8] sm:$0xff]  ;;  %v403_v10 = vld [vmem:[%s1707_s1 + $0x18] sm:$0xff] }
  0x19   : > { %v382_v5 = vld [vmem:[%s1706_s0] sm:$0xff]  ;;  %1252 = vmatmul.msk.f32.vlgmr.msra.gmra.mxu0 %vm417_vm0, %v400_v4  ;;  %595 = vmatpush.msra.mxu1 %v398_v3  ;;  %v385_v11 = vld [vmem:[%s1706_s0 + $0x18] sm:$0xff]  ;;  %v405_v14 = vld [vmem:[%s1707_s1 + $0x28] sm:$0xff] }
  0x1a   : > { %1268 = vmatmul.msk.f32.vlgmr.msra.gmra.mxu1 %vm531_vm1, %v382_v5  ;;  %v404_v12 = vld [vmem:[%s1707_s1 + $0x20] sm:$0xff]  ;;  %v387_v15 = vld [vmem:[%s1706_s0 + $0x28] sm:$0xff]  ;;  %v406_v16 = vld [vmem:[%s1707_s1 + $0x30] sm:$0xff] }
  0x1b   : > { %v386_v13 = vld [vmem:[%s1706_s0 + $0x20] sm:$0xff]  ;;  %v388_v17 = vld [vmem:[%s1706_s0 + $0x30] sm:$0xff]  ;;  %v407_v18 = vld [vmem:[%s1707_s1 + $0x38] sm:$0xff] }
  0x1c   : > { %v389_v19 = vld [vmem:[%s1706_s0 + $0x38] sm:$0xff]  ;;  %v408_v20 = vld [vmem:[%s1707_s1 + $0x40] sm:$0xff]  ;;  %v695_v23 = vld [vmem:[%s1711_s5 + $0x70] sm:$0xff] }
  0x1d   : > { %v390_v21 = vld [vmem:[%s1706_s0 + $0x40] sm:$0xff]  ;;  %v696_v22 = vld [vmem:[%s1711_s5 + $0x78] sm:$0xff]  ;;  %v409_v24 = vld [vmem:[%s1707_s1 + $0x48] sm:$0xff] }
  0x1e   : > { %697 = vmatpush.msra.mxu2 %v696_v22  ;;  %1289 = vmatpush.msra.mxu3 %v696_v22  ;;  %v391_v25 = vld [vmem:[%s1706_s0 + $0x48] sm:$0xff]  ;;  %v693_v27 = vld [vmem:[%s1711_s5 + $0x60] sm:$0xff]  ;;  %v692_v28 = vld [vmem:[%s1711_s5 + $0x58] sm:$0xff] }
  0x1f   : > { %v694_v26 = vld [vmem:[%s1711_s5 + $0x68] sm:$0xff]  ;;  %v410_v29 = vld [vmem:[%s1707_s1 + $0x50] sm:$0xff]  ;;  %v689_v33 = vld [vmem:[%s1711_s5 + $0x40] sm:$0xff] }
  0x20   : > { %698 = vmatpush.msra.mxu2 %v695_v23  ;;  %1290 = vmatpush.msra.mxu3 %v695_v23  ;;  %v691_v30 = vld [vmem:[%s1711_s5 + $0x50] sm:$0xff]  ;;  %v690_v32 = vld [vmem:[%s1711_s5 + $0x48] sm:$0xff]  ;;  %v688_v34 = vld [vmem:[%s1711_s5 + $0x38] sm:$0xff] }
  0x21   : > { %1253 = vmatmul.msk.f32.gmra.mxu0 %vm417_vm0, %v401_v6  ;;  %v392_v31 = vld [vmem:[%s1706_s0 + $0x50] sm:$0xff]  ;;  %v411_v35 = vld [vmem:[%s1707_s1 + $0x58] sm:$0xff]  ;;  %v686_v38 = vld [vmem:[%s1711_s5 + $0x28] sm:$0xff] }
  0x22   : > { %1269 = vmatmul.msk.f32.gmra.mxu1 %vm531_vm1, %v383_v7  ;;  %699 = vmatpush.msra.mxu2 %v694_v26  ;;  %v687_v36 = vld [vmem:[%s1711_s5 + $0x30] sm:$0xff]  ;;  %v393_v37 = vld [vmem:[%s1706_s0 + $0x58] sm:$0xff]  ;;  %v685_v39 = vld [vmem:[%s1711_s5 + $0x20] sm:$0xff] }
  0x23   : > { %1291 = vmatpush.msra.mxu3 %v694_v26  ;;  %v412_v40 = vld [vmem:[%s1707_s1 + $0x60] sm:$0xff]  ;;  %v684_v41 = vld [vmem:[%s1711_s5 + $0x18] sm:$0xff]  ;;  %v683_v43 = vld [vmem:[%s1711_s5 + $0x10] sm:$0xff] }
  0x24   : > { %700 = vmatpush.msra.mxu2 %v693_v27  ;;  %v394_v42 = vld [vmem:[%s1706_s0 + $0x60] sm:$0xff]  ;;  %v682_v44 = vld [vmem:[%s1711_s5 + $0x8] sm:$0xff]  ;;  %v414_v48 = vld [vmem:[%s1707_s1 + $0x70] sm:$0xff] }
  0x25   : > { %1292 = vmatpush.msra.mxu3 %v693_v27  ;;  %v681_v45 = vld [vmem:[%s1711_s5] sm:$0xff]  ;;  %v413_v46 = vld [vmem:[%s1707_s1 + $0x68] sm:$0xff]  ;;  %v396_v49 = vld [vmem:[%s1706_s0 + $0x70] sm:$0xff] }
  0x26   : > { %701 = vmatpush.msra.mxu2 %v692_v28  ;;  %v395_v47 = vld [vmem:[%s1706_s0 + $0x68] sm:$0xff]  ;;  %v415_v50 = vld [vmem:[%s1707_s1 + $0x78] sm:$0xff]  ;;  %v1667_v53 = vld [vmem:[%s1710_s4] ss:$0 sm:$0xff] }
  0x27   : > { %1293 = vmatpush.msra.mxu3 %v692_v28  ;;  %v397_v51 = vld [vmem:[%s1706_s0 + $0x78] sm:$0xff] }
  0x28   : > { %702 = vmatpush.msra.mxu2 %v691_v30 }
  0x29   : > { %1254 = vmatmul.msk.f32.gmra.mxu0 %vm417_vm0, %v402_v8  ;;  %1294 = vmatpush.msra.mxu3 %v691_v30 }
  0x2a   : > { %1270 = vmatmul.msk.f32.gmra.mxu1 %vm531_vm1, %v384_v9  ;;  %703 = vmatpush.msra.mxu2 %v690_v32 }
  0x2b   : > { %1295 = vmatpush.msra.mxu3 %v690_v32 }
  0x2c   : > { %704 = vmatpush.msra.mxu2 %v689_v33 }
  0x2d   : > { %1296 = vmatpush.msra.mxu3 %v689_v33 }
  0x2e   : > { %705 = vmatpush.msra.mxu2 %v688_v34 }
  0x2f   : > { %1297 = vmatpush.msra.mxu3 %v688_v34 }
  0x30   : > { %706 = vmatpush.msra.mxu2 %v687_v36 }
  0x31   : > { %1255 = vmatmul.msk.f32.gmra.mxu0 %vm417_vm0, %v403_v10  ;;  %1298 = vmatpush.msra.mxu3 %v687_v36 }
  0x32   : > { %1271 = vmatmul.msk.f32.gmra.mxu1 %vm531_vm1, %v385_v11  ;;  %707 = vmatpush.msra.mxu2 %v686_v38 }
  0x33   : > { %1299 = vmatpush.msra.mxu3 %v686_v38 }
  0x34   : > { %708 = vmatpush.msra.mxu2 %v685_v39 }
  0x35   : > { %1300 = vmatpush.msra.mxu3 %v685_v39 }
  0x36   : > { %709 = vmatpush.msra.mxu2 %v684_v41 }
  0x37   : > { %1301 = vmatpush.msra.mxu3 %v684_v41 }
  0x38   : > { %710 = vmatpush.msra.mxu2 %v683_v43 }
  0x39   : > { %1256 = vmatmul.msk.f32.gmra.mxu0 %vm417_vm0, %v404_v12  ;;  %1302 = vmatpush.msra.mxu3 %v683_v43 }
  0x3a   : > { %1272 = vmatmul.msk.f32.gmra.mxu1 %vm531_vm1, %v386_v13  ;;  %711 = vmatpush.msra.mxu2 %v682_v44 }
  0x3b   : > { %1303 = vmatpush.msra.mxu3 %v682_v44 }
  0x3c   : > { %712 = vmatpush.msra.mxu2 %v681_v45 }
  0x3d   : > { %1304 = vmatpush.msra.mxu3 %v681_v45 }
  0x41   : > { %1257 = vmatmul.msk.f32.gmra.mxu0 %vm417_vm0, %v405_v14 }
  0x42   : > { %1273 = vmatmul.msk.f32.gmra.mxu1 %vm531_vm1, %v387_v15 }
  0x49   : > { %1258 = vmatmul.msk.f32.gmra.mxu0 %vm417_vm0, %v406_v16 }
  0x4a   : > { %1274 = vmatmul.msk.f32.gmra.mxu1 %vm531_vm1, %v388_v17 }
  0x51   : > { %1259 = vmatmul.msk.f32.gmra.mxu0 %vm417_vm0, %v407_v18 }
  0x52   : > { %1275 = vmatmul.msk.f32.gmra.mxu1 %vm531_vm1, %v389_v19 }
  0x59   : > { %1260 = vmatmul.msk.f32.gmra.mxu0 %vm417_vm0, %v408_v20 }
  0x5a   : > { %1276 = vmatmul.msk.f32.gmra.mxu1 %vm531_vm1, %v390_v21 }
  0x61   : > { %1261 = vmatmul.msk.f32.gmra.mxu0 %vm417_vm0, %v409_v24 }
  0x62   : > { %1277 = vmatmul.msk.f32.gmra.mxu1 %vm531_vm1, %v391_v25 }
  0x69   : > { %1262 = vmatmul.msk.f32.gmra.mxu0 %vm417_vm0, %v410_v29 }
  0x6a   : > { %1278 = vmatmul.msk.f32.gmra.mxu1 %vm531_vm1, %v392_v31 }
  0x71   : > { %1263 = vmatmul.msk.f32.gmra.mxu0 %vm417_vm0, %v411_v35 }
  0x72   : > { %1279 = vmatmul.msk.f32.gmra.mxu1 %vm531_vm1, %v393_v37 }
  0x79   : > { %1264 = vmatmul.msk.f32.gmra.mxu0 %vm417_vm0, %v412_v40 }
  0x7a   : > { %1280 = vmatmul.msk.f32.gmra.mxu1 %vm531_vm1, %v394_v42 }
  0x81   : > { %1265 = vmatmul.msk.f32.gmra.mxu0 %vm417_vm0, %v413_v46 }
  0x82   : > { %1281 = vmatmul.msk.f32.gmra.mxu1 %vm531_vm1, %v395_v47 }
  0x89   : > { %1266 = vmatmul.msk.f32.gmra.mxu0 %vm417_vm0, %v414_v48 }
  0x8a   : > { %1282 = vmatmul.msk.f32.gmra.mxu1 %vm531_vm1, %v396_v49 }
  0x91   : > { %1267 = vmatmul.msk.f32.gmra.mxu0 %vm417_vm0, %v415_v50 }
  0x92   : > { %1283 = vmatmul.msk.f32.gmra.mxu1 %vm531_vm1, %v397_v51 }
  0x96   : > { %v483_v52 = vpop.f32.mrf.mxu0 }
  0x97   : > { %v597_v54 = vpop.f32.mrf.mxu1 }
  0x98   : > { %v598_v55 = vadd.f32 %v597_v54, %v483_v52 }
  0x9a   : > { %v649_v56 = vadd.f32 %v1667_v53, %v598_v55 }
  0x9c   : > { %v665_v57 = vmax.f32 %v649_v56, 0.0 }
  0x9e   : > { %v486_v58 = vpop.f32.mrf.mxu0  ;;  %713 = vmatmul.f32.vlgmr.msra.gmra.mxu2 %v665_v57 }
  0x9f   : > { %v600_v59 = vpop.f32.mrf.mxu1 }
  0xa0   : > { %v601_v60 = vadd.f32 %v600_v59, %v486_v58 }
  0xa2   : > { %v650_v61 = vadd.f32 %v1667_v53, %v601_v60 }
  0xa4   : > { %v666_v62 = vmax.f32 %v650_v61, 0.0 }
  0xa6   : > { %v489_v63 = vpop.f32.mrf.mxu0  ;;  %716 = vmatmul.f32.gmra.mxu2 %v666_v62 }
  0xa7   : > { %v603_v0 = vpop.f32.mrf.mxu1 }
  0xa8   : > { %v604_v1 = vadd.f32 %v603_v0, %v489_v63 }
  0xaa   : > { %v651_v2 = vadd.f32 %v1667_v53, %v604_v1 }
  0xac   : > { %v667_v3 = vmax.f32 %v651_v2, 0.0 }
  0xae   : > { %v492_v4 = vpop.f32.mrf.mxu0  ;;  %719 = vmatmul.f32.gmra.mxu2 %v667_v3 }
  0xaf   : > { %v606_v5 = vpop.f32.mrf.mxu1 }
  0xb0   : > { %v607_v6 = vadd.f32 %v606_v5, %v492_v4 }
  0xb2   : > { %v652_v7 = vadd.f32 %v1667_v53, %v607_v6 }
  0xb4   : > { %v668_v8 = vmax.f32 %v652_v7, 0.0 }
  0xb6   : > { %v495_v9 = vpop.f32.mrf.mxu0  ;;  %722 = vmatmul.f32.gmra.mxu2 %v668_v8 }
  0xb7   : > { %v609_v10 = vpop.f32.mrf.mxu1 }
  0xb8   : > { %v610_v11 = vadd.f32 %v609_v10, %v495_v9 }
  0xba   : > { %v653_v12 = vadd.f32 %v1667_v53, %v610_v11 }
  0xbc   : > { %v669_v13 = vmax.f32 %v653_v12, 0.0 }
  0xbe   : > { %v498_v14 = vpop.f32.mrf.mxu0  ;;  %725 = vmatmul.f32.gmra.mxu2 %v669_v13 }
  0xbf   : > { %v612_v15 = vpop.f32.mrf.mxu1 }
  0xc0   : > { %v613_v16 = vadd.f32 %v612_v15, %v498_v14 }
  0xc2   : > { %v654_v17 = vadd.f32 %v1667_v53, %v613_v16 }
  0xc4   : > { %v670_v18 = vmax.f32 %v654_v17, 0.0 }
  0xc6   : > { %v501_v19 = vpop.f32.mrf.mxu0  ;;  %728 = vmatmul.f32.gmra.mxu2 %v670_v18 }
  0xc7   : > { %v615_v20 = vpop.f32.mrf.mxu1 }
  0xc8   : > { %v616_v21 = vadd.f32 %v615_v20, %v501_v19 }
  0xca   : > { %v655_v22 = vadd.f32 %v1667_v53, %v616_v21 }
  0xcc   : > { %v671_v23 = vmax.f32 %v655_v22, 0.0 }
  0xce   : > { %v504_v24 = vpop.f32.mrf.mxu0  ;;  %731 = vmatmul.f32.gmra.mxu2 %v671_v23 }
  0xcf   : > { %v618_v25 = vpop.f32.mrf.mxu1 }
  0xd0   : > { %v619_v26 = vadd.f32 %v618_v25, %v504_v24 }
  0xd2   : > { %v656_v27 = vadd.f32 %v1667_v53, %v619_v26 }
  0xd4   : > { %v672_v28 = vmax.f32 %v656_v27, 0.0 }
  0xd6   : > { %v507_v29 = vpop.f32.mrf.mxu0  ;;  %734 = vmatmul.f32.gmra.mxu2 %v672_v28 }
  0xd7   : > { %v621_v30 = vpop.f32.mrf.mxu1 }
  0xd8   : > { %v622_v31 = vadd.f32 %v621_v30, %v507_v29 }
  0xda   : > { %v657_v32 = vadd.f32 %v1667_v53, %v622_v31 }
  0xdc   : > { %v673_v33 = vmax.f32 %v657_v32, 0.0 }
  0xde   : > { %v510_v34 = vpop.f32.mrf.mxu0  ;;  %737 = vmatmul.f32.gmra.mxu2 %v673_v33  ;;  %v1405_v33 = vmov 0.0  }
  0xdf   : > { %v624_v35 = vpop.f32.mrf.mxu1  ;;  %380 = vst [vmem:[#allocation3] sm:$0x1] %v1405_v33 }
  0xe0   : > { %v625_v36 = vadd.f32 %v624_v35, %v510_v34  ;;  %381 = vst [vmem:[#allocation4] sm:$0x1] %v1405_v33 }
  0xe2   : > { %v658_v37 = vadd.f32 %v1667_v53, %v625_v36 }
  0xe4   : > { %v674_v38 = vmax.f32 %v658_v37, 0.0 }
  0xe6   : > { %v513_v39 = vpop.f32.mrf.mxu0  ;;  %740 = vmatmul.f32.gmra.mxu2 %v674_v38 }
  0xe7   : > { %v627_v40 = vpop.f32.mrf.mxu1 }
  0xe8   : > { %v628_v41 = vadd.f32 %v627_v40, %v513_v39 }
  0xea   : > { %v659_v42 = vadd.f32 %v1667_v53, %v628_v41 }
  0xec   : > { %v675_v43 = vmax.f32 %v659_v42, 0.0 }
  0xee   : > { %v516_v44 = vpop.f32.mrf.mxu0  ;;  %743 = vmatmul.f32.gmra.mxu2 %v675_v43 }
  0xef   : > { %v630_v45 = vpop.f32.mrf.mxu1 }
  0xf0   : > { %v631_v46 = vadd.f32 %v630_v45, %v516_v44 }
  0xf2   : > { %v660_v47 = vadd.f32 %v1667_v53, %v631_v46 }
  0xf4   : > { %v676_v48 = vmax.f32 %v660_v47, 0.0 }
  0xf6   : > { %v519_v49 = vpop.f32.mrf.mxu0  ;;  %746 = vmatmul.f32.vlgmr.msra.gmra.mxu3 %v676_v48 }
  0xf7   : > { %v633_v50 = vpop.f32.mrf.mxu1 }
  0xf8   : > { %v634_v51 = vadd.f32 %v633_v50, %v519_v49 }
  0xfa   : > { %v661_v52 = vadd.f32 %v1667_v53, %v634_v51 }
  0xfc   : > { %v677_v54 = vmax.f32 %v661_v52, 0.0 }
  0xfe   : > { %v522_v55 = vpop.f32.mrf.mxu0  ;;  %749 = vmatmul.f32.gmra.mxu3 %v677_v54 }
  0xff   : > { %v636_v56 = vpop.f32.mrf.mxu1 }
 0x100   : > { %v637_v57 = vadd.f32 %v636_v56, %v522_v55 }
 0x102   : > { %v662_v58 = vadd.f32 %v1667_v53, %v637_v57 }
 0x104   : > { %v678_v59 = vmax.f32 %v662_v58, 0.0 }
 0x106   : > { %v525_v60 = vpop.f32.mrf.mxu0  ;;  %752 = vmatmul.f32.gmra.mxu3 %v678_v59 }
 0x107   : > { %v639_v61 = vpop.f32.mrf.mxu1 }
 0x108   : > { %v640_v62 = vadd.f32 %v639_v61, %v525_v60 }
 0x10a   : > { %v663_v63 = vadd.f32 %v1667_v53, %v640_v62 }
 0x10c   : > { %v679_v0 = vmax.f32 %v663_v63, 0.0 }
 0x10e   : > { %v528_v1 = vpop.f32.mrf.mxu0  ;;  %755 = vmatmul.f32.gmra.mxu3 %v679_v0 }
 0x10f   : > { %v642_v2 = vpop.f32.mrf.mxu1 }
 0x110   : > { %v643_v3 = vadd.f32 %v642_v2, %v528_v1 }
 0x112   : > { %v664_v4 = vadd.f32 %v1667_v53, %v643_v3 }
 0x114   : > { %v680_v5 = vmax.f32 %v664_v4, 0.0 }
 0x116   : > { %758 = vmatmul.f32.gmra.mxu3 %v680_v5 }
 0x121   : > { %v714_v6 = vpop.f32.mrf.mxu2 }
 0x122   : > { %764 = vst [vmem:[#allocation2 + $0x30] sm:$0xff] %v714_v6  ;;  %v906_v9 = vmul.f32 %v714_v6, %v714_v6 }
 0x129   : > { %v717_v7 = vpop.f32.mrf.mxu2 }
 0x12a   : > { %765 = vst [vmem:[#allocation2] sm:$0xff] %v717_v7  ;;  %v866_v8 = vmul.f32 0.0, %v717_v7 }
 0x12c   : > { %v882_v10 = vadd.f32 %v866_v8, %v714_v6  ;;  %v907_v11 = vmul.f32 %v866_v8, %v866_v8 }
 0x12e   : > { %v922_v12 = vadd.f32 %v907_v11, %v906_v9 }
 0x131   : > { %v720_v13 = vpop.f32.mrf.mxu2 }
 0x132   : > { %766 = vst [vmem:[#allocation2 + $0x58] sm:$0xff] %v720_v13  ;;  %v867_v14 = vmul.f32 0.0, %v720_v13 }
 0x134   : > { %v883_v15 = vadd.f32 %v882_v10, %v867_v14  ;;  %v908_v16 = vmul.f32 %v867_v14, %v867_v14 }
 0x136   : > { %v923_v17 = vadd.f32 %v922_v12, %v908_v16 }
 0x139   : > { %v723_v18 = vpop.f32.mrf.mxu2 }
 0x13a   : > { %767 = vst [vmem:[#allocation2 + $0x18] sm:$0xff] %v723_v18  ;;  %v868_v53 = vmul.f32 0.0, %v723_v18 }
 0x13c   : > { %v884_v19 = vadd.f32 %v883_v15, %v868_v53  ;;  %v909_v20 = vmul.f32 %v868_v53, %v868_v53 }
 0x13e   : > { %v924_v21 = vadd.f32 %v923_v17, %v909_v20 }
 0x141   : > { %v726_v22 = vpop.f32.mrf.mxu2 }
 0x142   : > { %768 = vst [vmem:[#allocation2 + $0x50] sm:$0xff] %v726_v22  ;;  %v869_v23 = vmul.f32 0.0, %v726_v22 }
 0x144   : > { %v885_v24 = vadd.f32 %v884_v19, %v869_v23  ;;  %v910_v25 = vmul.f32 %v869_v23, %v869_v23 }
 0x146   : > { %v925_v26 = vadd.f32 %v924_v21, %v910_v25 }
 0x149   : > { %v729_v27 = vpop.f32.mrf.mxu2 }
 0x14a   : > { %769 = vst [vmem:[#allocation2 + $0x68] sm:$0xff] %v729_v27  ;;  %v870_v36 = vmul.f32 0.0, %v729_v27 }
 0x14c   : > { %v911_v38 = vmul.f32 %v870_v36, %v870_v36  ;;  %v886_v40 = vadd.f32 %v885_v24, %v870_v36 }
 0x14e   : > { %v926_v44 = vadd.f32 %v925_v26, %v911_v38 }
 0x151   : > { %v732_v28 = vpop.f32.mrf.mxu2 }
 0x152   : > { %770 = vst [vmem:[#allocation2 + $0x8] sm:$0xff] %v732_v28  ;;  %v871_v37 = vmul.f32 0.0, %v732_v28  ;;  %v881_v28 = vld [vmem:[#allocation3] sm:$0x1] }
 0x154   : > { %v912_v41 = vmul.f32 %v871_v37, %v871_v37  ;;  %v887_v45 = vadd.f32 %v886_v40, %v871_v37 }
 0x156   : > { %v927_v48 = vadd.f32 %v926_v44, %v912_v41 }
 0x159   : > { %v735_v29 = vpop.f32.mrf.mxu2 }
 0x15a   : > { %771 = vst [vmem:[#allocation2 + $0x48] sm:$0xff] %v735_v29  ;;  %v872_v39 = vmul.f32 0.0, %v735_v29 }
 0x15c   : > { %v913_v46 = vmul.f32 %v872_v39, %v872_v39  ;;  %v888_v49 = vadd.f32 %v887_v45, %v872_v39 }
 0x15e   : > { %v928_v52 = vadd.f32 %v927_v48, %v913_v46 }
 0x161   : > { %v738_v30 = vpop.f32.mrf.mxu2 }
 0x162   : > { %772 = vst [vmem:[#allocation2 + $0x40] sm:$0xff] %v738_v30  ;;  %v873_v42 = vmul.f32 0.0, %v738_v30 }
 0x164   : > { %v914_v50 = vmul.f32 %v873_v42, %v873_v42  ;;  %v889_v54 = vadd.f32 %v888_v49, %v873_v42 }
 0x166   : > { %v929_v57 = vadd.f32 %v928_v52, %v914_v50 }
 0x169   : > { %v741_v31 = vpop.f32.mrf.mxu2 }
 0x16a   : > { %773 = vst [vmem:[#allocation2 + $0x20] sm:$0xff] %v741_v31  ;;  %v874_v47 = vmul.f32 0.0, %v741_v31  ;;  %v905_v31 = vld [vmem:[#allocation4] sm:$0x1] }
 0x16c   : > { %v915_v55 = vmul.f32 %v874_v47, %v874_v47  ;;  %v890_v58 = vadd.f32 %v889_v54, %v874_v47 }
 0x16e   : > { %v930_v62 = vadd.f32 %v929_v57, %v915_v55 }
 0x171   : > { %v744_v32 = vpop.f32.mrf.mxu2 }
 0x172   : > { %774 = vst [vmem:[#allocation2 + $0x10] sm:$0xff] %v744_v32  ;;  %v875_v51 = vmul.f32 0.0, %v744_v32 }
 0x174   : > { %v916_v59 = vmul.f32 %v875_v51, %v875_v51  ;;  %v891_v63 = vadd.f32 %v890_v58, %v875_v51 }
 0x176   : > { %v931_v2 = vadd.f32 %v930_v62, %v916_v59 }
 0x179   : > { %v747_v34 = vpop.f32.mrf.mxu3 }
 0x17a   : > { %775 = vst [vmem:[#allocation2 + $0x38] sm:$0xff] %v747_v34  ;;  %v876_v56 = vmul.f32 0.0, %v747_v34 }
 0x17c   : > { %v917_v0 = vmul.f32 %v876_v56, %v876_v56  ;;  %v892_v3 = vadd.f32 %v891_v63, %v876_v56 }
 0x17e   : > { %v932_v6 = vadd.f32 %v931_v2, %v917_v0 }
 0x181   : > { %v750_v35 = vpop.f32.mrf.mxu3 }
 0x182   : > { %776 = vst [vmem:[#allocation2 + $0x60] sm:$0xff] %v750_v35  ;;  %v877_v60 = vmul.f32 0.0, %v750_v35 }
 0x184   : > { %v918_v4 = vmul.f32 %v877_v60, %v877_v60  ;;  %v893_v7 = vadd.f32 %v892_v3, %v877_v60 }
 0x186   : > { %v933_v9 = vadd.f32 %v932_v6, %v918_v4 }
 0x189   : > { %v753_v43 = vpop.f32.mrf.mxu3 }
 0x18a   : > { %777 = vst [vmem:[#allocation2 + $0x70] sm:$0xff] %v753_v43  ;;  %v878_v1 = vmul.f32 0.0, %v753_v43 }
 0x18c   : > { %v919_v8 = vmul.f32 %v878_v1, %v878_v1  ;;  %v894_v10 = vadd.f32 %v893_v7, %v878_v1 }
 0x18e   : > { %v934_v13 = vadd.f32 %v933_v9, %v919_v8 }
 0x191   : > { %v756_v61 = vpop.f32.mrf.mxu3 }
 0x192   : > { %778 = vst [vmem:[#allocation2 + $0x78] sm:$0xff] %v756_v61  ;;  %v879_v5 = vmul.f32 0.0, %v756_v61 }
 0x194   : > { %v920_v11 = vmul.f32 %v879_v5, %v879_v5  ;;  %v895_v14 = vadd.f32 %v894_v10, %v879_v5 }
 0x196   : > { %v935_v16 = vadd.f32 %v934_v13, %v920_v11 }
 0x199   : > { %v759_v12 = vpop.f32.mrf.mxu3 }
 0x19a   : > { %779 = vst [vmem:[#allocation2 + $0x28] sm:$0xff] %v759_v12  ;;  %v880_v15 = vmul.f32 0.0, %v759_v12 }
 0x19c   : > { %v896_v17 = vadd.f32 %v895_v14, %v880_v15  ;;  %v921_v18 = vmul.f32 %v880_v15, %v880_v15 }
 0x19e   : > { %v897_v53 = vrot.slane %v896_v17, 4  ;;  %v936_v19 = vadd.f32 %v935_v16, %v921_v18 }
 0x1a0   : > { %v898_v20 = vadd.f32 %v897_v53, %v896_v17  ;;  %v937_v21 = vrot.slane %v936_v19, 4 }
 0x1a2   : > { %v899_v22 = vrot.slane %v898_v20, 2  ;;  %v938_v23 = vadd.f32 %v937_v21, %v936_v19 }
 0x1a4   : > { %v900_v24 = vadd.f32 %v899_v22, %v898_v20  ;;  %v939_v25 = vrot.slane %v938_v23, 2 }
 0x1a6   : > { %v901_v26 = vrot.slane %v900_v24, 1  ;;  %v940_v27 = vadd.f32 %v939_v25, %v938_v23 }
 0x1a8   : > { %v902_v29 = vadd.f32 %v901_v26, %v900_v24  ;;  %v941_v30 = vrot.slane %v940_v27, 1 }
 0x1aa   : > { %v903_v32 = vadd.f32 %v902_v29, %v881_v28  ;;  %v942_v33 = vadd.f32 %v941_v30, %v940_v27 }
 0x1ac   : > { %904 = vst [vmem:[#allocation3] sm:$0x1] %v903_v32  ;;  %v943_v34 = vadd.f32 %v942_v33, %v905_v31 }
 0x1ae   : > { %944 = vst [vmem:[#allocation4] sm:$0x1] %v943_v34 }
 0x1af PF: > { %p1284_p5 = scmp.ne.s32.totalorder %s1395_s29, 1 }
 0x1b1   : > { %1016 = sbr.rel (%p1284_p5) target bundleno = 815 (0x32f), region = 72 }
 0x1b6   : > { %v1021_v35 = vld [vmem:[#allocation3] sm:$0x1]  ;;  %v1023_v36 = vld [vmem:[#allocation4] sm:$0x1]  ;;  %vm1044_vm5 = vcmask 1040384   ;;  %v1053_v56 = vld [vmem:[#allocation2 + $0x30] sm:$0xff] }
 0x1b7   : > { %v1022_v37 = vmul.f32 0.125, %v1021_v35  ;;  %v1024_v38 = vmul.f32 0.125, %v1023_v36  ;;  %v1039_v49 = vld [vmem:[%s1712_s6] sm:$0x1]  ;;  %v1055_v60 = vld [vmem:[#allocation2 + $0x58] sm:$0xff]  ;;  %v1057_v0 = vld [vmem:[#allocation2 + $0x50] sm:$0xff] }
 0x1b8   : > { %v1054_v58 = vld [vmem:[#allocation2] sm:$0xff]  ;;  %v1056_v62 = vld [vmem:[#allocation2 + $0x18] sm:$0xff]  ;;  %v1058_v2 = vld [vmem:[#allocation2 + $0x68] sm:$0xff]  ;;  %v1406_v7 = vmov 0   ;;  %vm1049_vm6 = vcmask 0  }
 0x1b9   : > { %v1025_v39 = vmul.f32 %v1022_v37, %v1022_v37  ;;  %v1059_v4 = vld [vmem:[#allocation2 + $0x8] sm:$0xff]  ;;  %1344 = vset.pattern.permute.xlu1 %v1406_v7  ;;  %v1061_v9 = vld [vmem:[#allocation2 + $0x40] sm:$0xff]  ;;  %v1063_v14 = vld [vmem:[#allocation2 + $0x10] sm:$0xff] }
 0x1ba   : > { %v1060_v6 = vld [vmem:[#allocation2 + $0x48] sm:$0xff]  ;;  %v1062_v11 = vld [vmem:[#allocation2 + $0x20] sm:$0xff]  ;;  %v1064_v18 = vld [vmem:[#allocation2 + $0x38] sm:$0xff] }
 0x1bb   : > { %v1026_v40 = vsub.f32 %v1024_v38, %v1025_v39  ;;  %v1042_v13 = vld [vmem:[#allocation7] sm:$0x1]  ;;  %v1066_v22 = vld [vmem:[#allocation2 + $0x70] sm:$0xff]  ;;  %v1067_v24 = vld [vmem:[#allocation2 + $0x78] sm:$0xff] }
 0x1bc   : > { %v1065_v20 = vld [vmem:[#allocation2 + $0x60] sm:$0xff]  ;;  %v1068_v26 = vld [vmem:[#allocation2 + $0x28] sm:$0xff] }
 0x1bd   : > { %v1027_v41 = vmax.f32 %v1026_v40, 0.0 }
 0x1bf   : > { %v1028_v42 = vadd.f32 1e-05, %v1027_v41 }
 0x1c1   : > { %1347 = vrsqrt.f32 %v1028_v42  ;;  %vm1035_vm2 = vweird.f32 %v1028_v42 }
 0x1c7   : > { %v1348_v43 = vpop.eup %1347 }
 0x1c8   : > { %v1030_v44 = vmul.f32 %v1348_v43, %v1028_v42  ;;  %vm1036_vm3 = vweird.f32 %v1348_v43 }
 0x1c9   : > { %vm1037_vm4 = vmor %vm1035_vm2, %vm1036_vm3 }
 0x1ca   : > { %v1031_v45 = vmul.f32 %v1348_v43, %v1030_v44 }
 0x1cc   : > { %v1032_v46 = vmul.f32 0.5, %v1031_v45 }
 0x1ce   : > { %v1033_v47 = vsub.f32 1.5, %v1032_v46 }
 0x1d0   : > { %v1034_v48 = vmul.f32 %v1348_v43, %v1033_v47 }
 0x1d2   : > { %v1038_v50 = vsel %vm1037_vm4, %v1348_v43, %v1034_v48 }
 0x1d3   : > { %v1040_v51 = vmul.f32 %v1039_v49, %v1038_v50 }
 0x1d5   : > { %v1043_v52 = vmul.f32 %v1040_v51, %v1022_v37  ;;  %1041 = vst [vmem:[#allocation5] sm:$0x1] %v1040_v51 }
 0x1d7   : > { %v1045_v54 = vsel %vm1044_vm5, %v1043_v52, 0.0 }
 0x1d8   : > { %1046 = vadd.xlane.f32.xlu0 %v1045_v54 }
 0x1dc   : > { %v1346_v55 = vld [vmem:[#allocation5] ss:$0 sm:$0xff] }
 0x1dd   : > { %v1073_v57 = vmul.f32 %v1346_v55, %v1053_v56  ;;  %v1074_v59 = vmul.f32 %v1346_v55, %v1054_v58  ;;  %v1075_v61 = vmul.f32 %v1346_v55, %v1055_v60  ;;  %v1076_v63 = vmul.f32 %v1346_v55, %v1056_v62 }
 0x1de   : > { %v1077_v1 = vmul.f32 %v1346_v55, %v1057_v0  ;;  %v1078_v3 = vmul.f32 %v1346_v55, %v1058_v2  ;;  %v1079_v5 = vmul.f32 %v1346_v55, %v1059_v4  ;;  %v1080_v8 = vmul.f32 %v1346_v55, %v1060_v6 }
 0x1df   : > { %v1081_v10 = vmul.f32 %v1346_v55, %v1061_v9  ;;  %v1082_v12 = vmul.f32 %v1346_v55, %v1062_v11  ;;  %v1083_v17 = vmul.f32 %v1346_v55, %v1063_v14  ;;  %v1084_v19 = vmul.f32 %v1346_v55, %v1064_v18 }
 0x1e0   : > { %v1085_v21 = vmul.f32 %v1346_v55, %v1065_v20  ;;  %v1086_v23 = vmul.f32 %v1346_v55, %v1066_v22  ;;  %v1087_v25 = vmul.f32 %v1346_v55, %v1067_v24  ;;  %v1088_v27 = vmul.f32 %v1346_v55, %v1068_v26 }
 0x201   : > { %1089 = vxpose.xlu0.b32.start [1/16] %v1073_v57, 128 }
 0x209   : > { %1090 = vxpose.xlu0.b32.cont [2/16] %v1074_v59, 128 }
 0x211   : > { %1091 = vxpose.xlu0.b32.cont [3/16] %v1075_v61, 128 }
 0x219   : > { %1092 = vxpose.xlu0.b32.cont [4/16] %v1076_v63, 128 }
 0x221   : > { %1093 = vxpose.xlu0.b32.cont [5/16] %v1077_v1, 128 }
 0x229   : > { %1094 = vxpose.xlu0.b32.cont [6/16] %v1078_v3, 128 }
 0x231   : > { %1095 = vxpose.xlu0.b32.cont [7/16] %v1079_v5, 128 }
 0x239   : > { %1096 = vxpose.xlu0.b32.cont [8/16] %v1080_v8, 128 }
 0x241   : > { %1097 = vxpose.xlu0.b32.cont [9/16] %v1081_v10, 128 }
 0x249   : > { %1098 = vxpose.xlu0.b32.cont [10/16] %v1082_v12, 128 }
 0x24b   : > { %v1047_v15 = vpop.xlane.xlu0 %1046 }
 0x24c   : > { %v1048_v16 = vsub.f32 %v1042_v13, %v1047_v15 }
 0x24e   : > { %1050 = vst.msk [vmem:[#allocation6] sm:$0x1] %vm1049_vm6, %v1048_v16 }
 0x251   : > { %1099 = vxpose.xlu0.b32.cont [11/16] %v1083_v17, 128 }
 0x255   : > { %v1142_v53 = vld [vmem:[#allocation6] sm:$0x1] }
 0x256   : > { %1145 = vperm.xlu1 %1344, %v1142_v53  }
 0x259   : > { %1100 = vxpose.xlu0.b32.cont [12/16] %v1084_v19, 128 }
 0x261   : > { %1101 = vxpose.xlu0.b32.cont [13/16] %v1085_v21, 128 }
 0x269   : > { %1102 = vxpose.xlu0.b32.cont [14/16] %v1086_v23, 128 }
 0x271   : > { %1103 = vxpose.xlu0.b32.cont [15/16] %v1087_v25, 128 }
 0x279   : > { %1104 = vxpose.xlu0.b32.end [16/16] %v1088_v27, 128 }
 0x2a5   : > { %v1105_v28 = vpop.trf.xlu0 }
 0x2ad   : > { %v1106_v29 = vpop.trf.xlu0 }
 0x2ae   : > { %v1121_v30 = vadd.f32 %v1106_v29, %v1105_v28 }
 0x2b5   : > { %v1107_v31 = vpop.trf.xlu0 }
 0x2b6   : > { %v1122_v32 = vadd.f32 %v1121_v30, %v1107_v31 }
 0x2bd   : > { %v1108_v33 = vpop.trf.xlu0 }
 0x2be   : > { %v1123_v34 = vadd.f32 %v1122_v32, %v1108_v33 }
 0x2c5   : > { %v1109_v35 = vpop.trf.xlu0 }
 0x2c6   : > { %v1124_v36 = vadd.f32 %v1123_v34, %v1109_v35 }
 0x2c8   : > { %v1146_v0 = vpop.permute.xlu1 %1145 }
 0x2c9   : > { %v1148_v2 = vperm.slane %v1146_v0, 0 }
 0x2cd   : > { %v1110_v37 = vpop.trf.xlu0 }
 0x2ce   : > { %v1125_v45 = vadd.f32 %v1124_v36, %v1110_v37 }
 0x2d5   : > { %v1111_v38 = vpop.trf.xlu0 }
 0x2d6   : > { %v1126_v46 = vadd.f32 %v1125_v45, %v1111_v38 }
 0x2dd   : > { %v1112_v39 = vpop.trf.xlu0 }
 0x2de   : > { %v1127_v48 = vadd.f32 %v1126_v46, %v1112_v39 }
 0x2e0   : > { %1345 = vset.pattern.permute.xlu0 %v1406_v7 }
 0x2e5   : > { %v1113_v40 = vpop.trf.xlu0 }
 0x2e6   : > { %v1128_v49 = vadd.f32 %v1127_v48, %v1113_v40 }
 0x2ed   : > { %v1114_v41 = vpop.trf.xlu0 }
 0x2ee   : > { %v1129_v50 = vadd.f32 %v1128_v49, %v1114_v41 }
 0x2f5   : > { %v1115_v42 = vpop.trf.xlu0 }
 0x2f6   : > { %v1130_v51 = vadd.f32 %v1129_v50, %v1115_v42 }
 0x2fd   : > { %v1116_v43 = vpop.trf.xlu0 }
 0x2fe   : > { %v1131_v54 = vadd.f32 %v1130_v51, %v1116_v43 }
 0x305   : > { %v1117_v44 = vpop.trf.xlu0 }
 0x306   : > { %v1132_v55 = vadd.f32 %v1131_v54, %v1117_v44 }
 0x30d   : > { %v1118_v47 = vpop.trf.xlu0 }
 0x30e   : > { %v1133_v56 = vadd.f32 %v1132_v55, %v1118_v47 }
 0x315   : > { %v1119_v52 = vpop.trf.xlu0 }
 0x316   : > { %v1134_v57 = vadd.f32 %v1133_v56, %v1119_v52 }
 0x31d   : > { %v1120_v58 = vpop.trf.xlu0 }
 0x31e   : > { %v1135_v59 = vadd.f32 %v1134_v57, %v1120_v58 }
 0x320   : > { %v1136_v60 = vrot.slane %v1135_v59, 4 }
 0x322   : > { %v1137_v61 = vadd.f32 %v1136_v60, %v1135_v59 }
 0x324   : > { %v1138_v62 = vrot.slane %v1137_v61, 2 }
 0x326   : > { %v1139_v63 = vadd.f32 %v1138_v62, %v1137_v61 }
 0x328   : > { %v1140_v1 = vrot.slane %v1139_v63, 1 }
 0x32a   : > { %v1141_v3 = vadd.f32 %v1140_v1, %v1139_v63 }
 0x32c   : > { %v1149_v4 = vadd.f32 %v1148_v2, %v1141_v3 }
 0x32e   : > { %1150 = vst [vmem:[#allocation8] sm:$0x1] %v1149_v4 }
 0x32f PF: > { %p1313_p6 = scmp.eq.s32.totalorder %s1244_s7, 1  ;;  %s1165_s17 = sshll.u32 %s1714_s8, 4  ;;  %s1166_s17 = int_to_ptr.hbm [resolvable:$true] %s1165_s17 }
 0x330   : > { %s1407_s18 = smov [#allocation8]  }
 0x331   : > { %s1163_s19 = sshll.u32 %s1407_s18, 4  ;;  %s1164_s19 = int_to_ptr.vmem [resolvable:$true] %s1163_s19 }
 0x332   : > { %1306 = dma.vmem_to_hbm [thread:$0]  (%p1313_p6), %s1164_s19, 16, %s1166_s17, [#allocation9]  }
 0x333 PF: > { %p1314_p7 = scmp.ge.s32.totalorder %s1403_s9, 2  ;;  %p1315_p8 = scmp.eq.s32.totalorder %s1245_s10, 1 }
 0x335   : > { %p1310_p9 = pnand %p1315_p8, %p1314_p7 }
 0x337   : > { %p1311_p10 = pneg %p1310_p9 }
 0x339   : > { %1390 = dma.done.wait (%p1311_p10), [#allocation9], 16  }
 0x33a   : > { %1392 = vsyncadd (%p1311_p10), [#allocation9], 4294967280  ;;  %s23_s9 = sadd.s32 1, %s1403_s9   ;;  %s1715_s29 = smov %s1399_s30 }
 0x33b   : > { %p20_p11 = scmp.ge.s32.totalorder %s23_s9, 4   ;;  %s1716_s30 = smov %s1718_s11 }
 0x33d   :  { %22 = sbr.rel (!%p20_p11) target bundleno = 6 (0x6), region = 116 }
 0x342   :  { %1183 = vsyncpa [#allocation9], 1 }
 0x343   :  { %1185 = vsyncpa [#allocation9 + $0x1], 1 }

</bundles_post_ra>
